<compile_context>
chip_gen: v5e
topology: v5e:2x2
jax: 0.10.0
libtpu: 0.0.40
codegen_flags: <defaults>
</compile_context>

<pallas_src>
import functools
import math

import jax
import jax.numpy as jnp
from jax.experimental import pallas as pl
from jax.experimental.pallas import tpu as pltpu


def _choose_slab(total: int, itemsize: int) -> tuple[int, int]:
    """Pick a (rows, cols) factorization of `total` for the internal copy slab.

    Any factorization preserves row-major order for an identity copy; prefer a
    lane-dense cols (multiple of 128) so the DMA descriptors stay simple.
    Falls back to a single row for awkward totals (still a contiguous copy).
    """
    del itemsize  # packing only matters for VMEM-staged copies; DMA path doesn't care
    if total % 128 == 0:
        for cols in (512, 1024, 2048, 256, 128):
            if total % cols == 0:
                return total // cols, cols
        return total // 128, 128
    return 1, total


def _row_chunks(rows: int, cols: int, itemsize: int,
                target_bytes: int = 8 << 20, max_chunks: int = 8):
    """Static (start, size) row chunks so several HBM->HBM DMAs overlap."""
    row_bytes = max(1, cols * itemsize)
    total_bytes = rows * row_bytes
    want = max(1, min(max_chunks, (total_bytes + target_bytes - 1) // target_bytes))
    want = min(want, rows)
    base, rem = divmod(rows, want)
    chunks = []
    start = 0
    for i in range(want):
        size = base + (1 if i < rem else 0)
        if size == 0:
            continue
        chunks.append((start, size))
        start += size
    return chunks


def _make_hbm_copy_kernel(chunks):
    """Kernel: issue one HBM->HBM DMA per static row chunk, then wait all."""
    def kernel(x_hbm, o_hbm, sems):
        copies = []
        for idx, (r0, rn) in enumerate(chunks):
            cp = pltpu.make_async_copy(
                x_hbm.at[pl.ds(r0, rn), :],
                o_hbm.at[pl.ds(r0, rn), :],
                sems.at[idx],
            )
            cp.start()
            copies.append(cp)
        for cp in copies:
            cp.wait()
    return kernel


def flatten(x: jax.Array, start_dim: int = 1) -> jax.Array:
    """Pallas equivalent of torch.flatten(x, start_dim)."""
    if start_dim < 0:
        start_dim += x.ndim
    lead = x.shape[:start_dim]
    flat = math.prod(x.shape[start_dim:]) if x.ndim > start_dim else 1
    out_shape = lead + (flat,)

    total = max(1, math.prod(x.shape))
    itemsize = jnp.dtype(x.dtype).itemsize

    # Wrapper-side reshape (metadata-only): present the kernel with a simple
    # 2-D slab; the semantic (lead, flat) split is reapplied on the output.
    rows, cols = _choose_slab(total, itemsize)
    x2 = x.reshape(rows, cols)
    chunks = _row_chunks(rows, cols, itemsize)

    y2 = pl.pallas_call(
        _make_hbm_copy_kernel(chunks),
        out_shape=jax.ShapeDtypeStruct((rows, cols), x.dtype),
        in_specs=[pl.BlockSpec(memory_space=pl.ANY)],    # raw HBM ref, no auto-DMA
        out_specs=pl.BlockSpec(memory_space=pl.ANY),     # raw HBM ref, written via DMA
        scratch_shapes=[pltpu.SemaphoreType.DMA((len(chunks),))],
        cost_estimate=pl.CostEstimate(
            flops=0,
            transcendentals=0,
            bytes_accessed=2 * total * itemsize),
    )(x2)

    return y2.reshape(out_shape)


if __name__ == "__main__":
    key = jax.random.PRNGKey(0)
    # Small NCHW input consistent with a conv feature map: (N=2, C=4, H=16, W=16)
    x = jax.random.normal(key, (2, 4, 16, 16), dtype=jnp.float32)

    flatten_fn = jax.jit(functools.partial(flatten, start_dim=1))
    y = flatten_fn(x)
    y = jax.block_until_ready(y)

    # Reference: plain row-major reshape (== torch.flatten(start_dim=1)).
    y_ref = x.reshape(x.shape[0], -1)
    assert y.shape == (2, 4 * 16 * 16), y.shape
    assert y.dtype == x.dtype
    assert bool(jnp.all(y == y_ref))

    print("KERNEL_OK")
</pallas_src>

<mosaic_0001>
module attributes {stable_mosaic.version = 11 : i64} {
  func.func @kernel(%arg0: memref<4x512xf32, #tpu.memory_space<any>>, %arg1: memref<4x512xf32, #tpu.memory_space<any>>, %arg2: memref<1x!tpu.dma_semaphore, #tpu.memory_space<semaphore_mem>>) attributes {dimension_semantics = [], scalar_prefetch = 0 : i64, scratch_operands = 1 : i64, tpu.core_type = #tpu.core_type<tc>} {
    %c0_i32 = arith.constant 0 : i32
    %c0_i32_0 = arith.constant 0 : i32
    %c0_i32_1 = arith.constant 0 : i32
    %0 = tpu.memref_slice %arg0[%c0_i32_0, %c0_i32_1] : memref<4x512xf32, #tpu.memory_space<any>> -> memref<4x512xf32, #tpu.memory_space<any>>
    %c0_i32_2 = arith.constant 0 : i32
    %c0_i32_3 = arith.constant 0 : i32
    %1 = tpu.memref_slice %arg1[%c0_i32_2, %c0_i32_3] : memref<4x512xf32, #tpu.memory_space<any>> -> memref<4x512xf32, #tpu.memory_space<any>>
    %2 = tpu.memref_slice %arg2[%c0_i32] : memref<1x!tpu.dma_semaphore, #tpu.memory_space<semaphore_mem>> -> memref<1x!tpu.dma_semaphore, #tpu.memory_space<semaphore_mem>>
    %3 = tpu.memref_squeeze %2 : memref<1x!tpu.dma_semaphore, #tpu.memory_space<semaphore_mem>> -> memref<!tpu.dma_semaphore, #tpu.memory_space<semaphore_mem>>
    tpu.enqueue_dma source(%0 : memref<4x512xf32, #tpu.memory_space<any>>) target(%1 : memref<4x512xf32, #tpu.memory_space<any>>) target_semaphore(%3 : memref<!tpu.dma_semaphore, #tpu.memory_space<semaphore_mem>>)
    %c0_i32_4 = arith.constant 0 : i32
    %c0_i32_5 = arith.constant 0 : i32
    %c0_i32_6 = arith.constant 0 : i32
    %4 = tpu.memref_slice %arg0[%c0_i32_5, %c0_i32_6] : memref<4x512xf32, #tpu.memory_space<any>> -> memref<4x512xf32, #tpu.memory_space<any>>
    %c0_i32_7 = arith.constant 0 : i32
    %c0_i32_8 = arith.constant 0 : i32
    %5 = tpu.memref_slice %arg1[%c0_i32_7, %c0_i32_8] : memref<4x512xf32, #tpu.memory_space<any>> -> memref<4x512xf32, #tpu.memory_space<any>>
    %6 = tpu.memref_slice %arg2[%c0_i32_4] : memref<1x!tpu.dma_semaphore, #tpu.memory_space<semaphore_mem>> -> memref<1x!tpu.dma_semaphore, #tpu.memory_space<semaphore_mem>>
    %7 = tpu.memref_squeeze %6 : memref<1x!tpu.dma_semaphore, #tpu.memory_space<semaphore_mem>> -> memref<!tpu.dma_semaphore, #tpu.memory_space<semaphore_mem>>
    tpu.wait_dma2 semaphore(%7 : memref<!tpu.dma_semaphore, #tpu.memory_space<semaphore_mem>>) src(%4 : memref<4x512xf32, #tpu.memory_space<any>>) dst(%5 : memref<4x512xf32, #tpu.memory_space<any>>)
    return
  }
}

</mosaic_0001>

<bundles_post_ra>
// kernel: flatten.1
= control target key start
LH: loop header
LB: loop body
LE: loop exit
PB: predicated region body
PF: predicated region fallthrough
CT: control target
= control target key end

     0   :  { %s65_s0 = inlined_call_operand.vmem [shape: f32[4,512], index: 0, kind: input, shape index: {}]   ;;  %s66_s1 = inlined_call_operand.vmem [shape: f32[4,512], index: 1, kind: output, shape index: {}]  }
   0x1   :  { %v16_v0 = vld [vmem:[%s65_s0] sm:$0xff]  ;;  %v18_v1 = vld [vmem:[%s65_s0 + $0x8] sm:$0xff] }
   0x2   :  { %17 = vst [vmem:[%s66_s1] sm:$0xff] %v16_v0 }
   0x3   :  { %19 = vst [vmem:[%s66_s1 + $0x8] sm:$0xff] %v18_v1 }
   0x4   :  { %25 = vsyncadd [#allocation2], 256 }
   0x5   :  { %41 = dma.done.wait [#allocation2], 256 }
   0x6   :  { %42 = vsyncadd [#allocation2], 4294967040 }
   0x7   :  { %30 = vsyncmov [#allocation2] }
   0xa   :  { %s31_s14 = vpop.sfrf %30 }
   0xb   :  { %p40_p0 = scmp.ne.s32.totalorder %s31_s14, 0 }
   0xd   :  { %35 = shalt.err (%p40_p0)  }

</bundles_post_ra>
